<compile_context>
chip_gen: v7x
topology: tpu7x:2x2x1
jax: 0.10.0
libtpu: 0.0.40
codegen_flags: <defaults>
</compile_context>

<pallas_src>
import functools

import jax
import jax.numpy as jnp
import numpy as np
from jax.experimental import pallas as pl
from jax.experimental.pallas import tpu as pltpu


def _round_up(x, m):
    return ((x + m - 1) // m) * m


def _apply_activation(y, activation):
    # y is f32; element-wise math stays in f32 (v5e VPU/EUP have no bf16).
    if activation == "ReLU":
        return jnp.maximum(y, 0.0)
    if activation == "LeakyReLU":
        return jnp.where(y >= 0.0, y, 0.01 * y)
    if activation == "Tanh":
        return jnp.tanh(y)
    if activation == "Sigmoid":
        return jax.nn.sigmoid(y)
    if activation == "ELU":
        return jnp.where(y >= 0.0, y, jnp.expm1(y))
    raise ValueError(f"Unsupported activation: {activation}")


# -----------------------------------------------------------------------------
# Fused Pallas kernel: whole ronn layer stack for one (batch, L-tile) grid cell.
# -----------------------------------------------------------------------------
def _fused_ronn_kernel(x_hbm, *refs, n_layers, kernel_size, dilations,
                       tile_l, tile_in, compute_dtype, activation, residual):
    # x_hbm : (N, C_in0, L_pad) left in HBM (pl.ANY) — manually DMA'd with a halo.
    # refs  : n_layers weight refs (K, C_out_n, C_in_n)      [compute dtype]
    #         n_layers bias   refs (C_out_n, 1)              [f32]
    #         o_ref (1, C_out_last, tile_l)
    #         xbuf (2, C_in0, tile_in) double buffer, sem (2,) DMA semaphores.
    w_refs = refs[:n_layers]
    b_refs = refs[n_layers:2 * n_layers]
    o_ref = refs[2 * n_layers]
    xbuf = refs[2 * n_layers + 1]
    sem = refs[2 * n_layers + 2]

    b = pl.program_id(0)
    t = pl.program_id(1)
    n_t = pl.num_programs(1)
    slot = t % 2

    def copy_for(tile_idx, s):
        start = pl.multiple_of(tile_idx * tile_l, 128)
        return pltpu.make_async_copy(
            x_hbm.at[b, :, pl.ds(start, tile_in)], xbuf.at[s], sem.at[s])

    # Prime the double buffer at the start of each batch row.  The tile axis is
    # "arbitrary" (sequential, in order, on one core per batch row), so every tile's
    # window was either primed here (t==0) or prefetched by the previous step.
    @pl.when(t == 0)
    def _():
        copy_for(0, 0).start()

    # Prefetch the next tile of this batch row into the other slot (overlaps with
    # the compute below and with the auto-pipelined output writeback).
    @pl.when(t + 1 < n_t)
    def _():
        copy_for(t + 1, 1 - slot).start()

    copy_for(t, slot).wait()

    K = kernel_size
    act = xbuf[slot].astype(jnp.float32)          # layer input, f32
    l_cur = tile_in
    for n in range(n_layers):
        d = dilations[n]
        l_next = l_cur - d * (K - 1)
        a_c = act.astype(compute_dtype)
        # Dilated conv as K accumulated MXU matmuls (no im2col copy, f32 accumulation).
        y = jnp.dot(w_refs[n][0], a_c[:, :l_next],
                    preferred_element_type=jnp.float32)        # (C_out_n, l_next)
        for k in range(1, K):
            y = y + jnp.dot(w_refs[n][k], a_c[:, k * d:k * d + l_next],
                            preferred_element_type=jnp.float32)
        y = y + b_refs[n][...]                                 # f32 bias add (VPU)
        y = _apply_activation(y, activation)
        if residual:
            off = (l_cur - l_next) // 2                        # centre crop of input
            y = y + act[:, off:off + l_next]                   # broadcasts like torch.add
        act = y
        l_cur = l_next

    # l_cur >= tile_l here (halo was rounded up to a 128 multiple); keep lane-dense
    # first tile_l columns for the output store.
    o_ref[0] = act[:, :tile_l].astype(o_ref.dtype)


# -----------------------------------------------------------------------------
# Wrapper: one pallas_call for the whole model.
# -----------------------------------------------------------------------------
def ronn_forward(params, x, *, dilation_growth=2, stride=1, activation="ReLU",
                 residual=False, tile_l=None, compute_dtype=jnp.bfloat16,
                 stream_dtype=None):
    """x: (N, C_in, L).  params[n] = {"w": (C_out, C_in, K), "b": (C_out,)}."""
    assert stride == 1, "only stride=1 (module default) is implemented"
    # TODO(synk): FiLM-conditioned path (GlobalConditionGenerator / adpt Linear /
    # FiLM) is only taken when y is not None; its source was not provided, so only
    # the unconditioned forward is implemented.
    N, c_in0, L = x.shape
    out_dtype = x.dtype
    n_layers = len(params)
    K = int(params[0]["w"].shape[-1])
    dilations = tuple(dilation_growth ** n for n in range(n_layers))
    halo = sum(d * (K - 1) for d in dilations)      # total receptive field - 1
    L_out = L - halo
    assert L_out > 0, "input too short for the stack's receptive field"

    if residual:
        for p in params:
            c_out, c_in, _ = p["w"].shape
            if not (c_in == c_out or c_in == 1):
                # TODO(synk): torch.add broadcasting with c_out==1 & c_in>1 changes
                # the output channel count; not supported here.
                raise NotImplementedError("residual add needs c_in == c_out or c_in == 1")

    c_out_last = int(params[-1]["w"].shape[0])
    max_c = max(max(int(p["w"].shape[0]), int(p["w"].shape[1])) for p in params)

    if stream_dtype is None:
        stream_dtype = x.dtype          # keep input traffic in x's dtype (exact path)
    stream_isz = jnp.dtype(stream_dtype).itemsize
    out_isz = jnp.dtype(out_dtype).itemsize

    # Lane-dense output tiles (multiple of 128), sized from an explicit VMEM budget
    # (~16 MiB of tile-scaling data) so the largest practical tile is used while still
    # fitting v7x's 64 MiB/TC VMEM; cap at 8192 lanes.
    if tile_l is None:
        bytes_per_lane = (2 * c_in0 * stream_isz      # double-buffered halo'd input
                          + 2 * c_out_last * out_isz  # double-buffered output block
                          + 12 * max_c)               # f32 + compute-dtype layer temporaries
        budget = 16 << 20
        cap = min(8192, max(128, (budget // bytes_per_lane) // 128 * 128))
        tile_l = min(_round_up(L_out, 128), cap)
    else:
        tile_l = max(128, _round_up(int(tile_l), 128))

    n_tiles = pl.cdiv(L_out, tile_l)
    halo_pad = _round_up(halo, 128)     # 128-aligned fetched window
    tile_in = tile_l + halo_pad

    # Pad L so every tile's halo'd window is in-bounds; padded tail only feeds output
    # columns beyond L_out, which are sliced off below.
    L_needed = (n_tiles - 1) * tile_l + tile_in
    x_s = x.astype(stream_dtype)
    if L_needed > L:
        x_s = jnp.pad(x_s, ((0, 0), (0, 0), (0, L_needed - L)))

    # Weights tap-major (K, C_out, C_in) in the compute dtype; biases separate, f32.
    w_list, b_list = [], []
    for p in params:
        w_list.append(jnp.transpose(p["w"], (2, 0, 1)).astype(compute_dtype))
        b_list.append(p["b"].reshape(-1, 1).astype(jnp.float32))

    kernel = functools.partial(
        _fused_ronn_kernel,
        n_layers=n_layers, kernel_size=K, dilations=dilations,
        tile_l=tile_l, tile_in=tile_in, compute_dtype=compute_dtype,
        activation=activation, residual=residual)

    in_specs = [pl.BlockSpec(memory_space=pl.ANY)]            # x stays in HBM
    in_specs += [pl.BlockSpec(w.shape, lambda b, t: (0, 0, 0)) for w in w_list]
    in_specs += [pl.BlockSpec(bb.shape, lambda b, t: (0, 0)) for bb in b_list]

    # Advisory cost estimate for XLA scheduling around the fused call.
    flops = int(2 * N * L_out * sum(int(np.prod(p["w"].shape)) for p in params))
    transc = 0 if activation in ("ReLU", "LeakyReLU") else int(
        N * L_out * sum(int(p["w"].shape[0]) for p in params))
    bytes_acc = int(x.size * jnp.dtype(x.dtype).itemsize
                    + N * c_out_last * L_out * out_isz
                    + 4 * sum(int(np.prod(p["w"].shape)) + int(p["b"].size) for p in params))

    out_len = n_tiles * tile_l
    # Double-buffering needs the tile axis to run sequentially within a batch row;
    # when there is only one tile per row every grid step is independent, so both
    # axes can be parallel (v7x 2-TC friendly).
    semantics = ("parallel", "arbitrary" if n_tiles > 1 else "parallel")

    out = pl.pallas_call(
        kernel,
        out_shape=jax.ShapeDtypeStruct((N, c_out_last, out_len), out_dtype),
        grid=(N, n_tiles),
        in_specs=in_specs,
        out_specs=pl.BlockSpec((1, c_out_last, tile_l), lambda b, t: (b, 0, t)),
        scratch_shapes=[
            pltpu.VMEM((2, c_in0, tile_in), stream_dtype),    # double-buffered input window
            pltpu.SemaphoreType.DMA((2,)),
        ],
        compiler_params=pltpu.CompilerParams(
            dimension_semantics=semantics,
            vmem_limit_bytes=48 << 20),
        cost_estimate=pl.CostEstimate(flops=flops, transcendentals=transc,
                                      bytes_accessed=bytes_acc),
    )(x_s, *w_list, *b_list)

    if out_len != L_out:
        out = out[:, :, :L_out]
    return out


# -----------------------------------------------------------------------------
# Parameter init (init='normal': weights ~ N(0,1); biases = PyTorch Conv1d default).
# -----------------------------------------------------------------------------
def init_ronn_params(key, *, n_inputs, n_outputs, n_layers, n_channels, kernel_size):
    params = []
    for n in range(n_layers):
        in_ch = n_channels if n != 0 else n_inputs
        out_ch = n_channels if n != n_layers - 1 else n_outputs
        key, kw, kb = jax.random.split(key, 3)
        w = jax.random.normal(kw, (out_ch, in_ch, kernel_size), dtype=jnp.float32)
        bound = 1.0 / np.sqrt(in_ch * kernel_size)
        b = jax.random.uniform(kb, (out_ch,), minval=-bound, maxval=bound,
                               dtype=jnp.float32)
        params.append({"w": w, "b": b})
    return params


# -----------------------------------------------------------------------------
# Plain-JAX reference (sanity check for the Pallas kernel).
# -----------------------------------------------------------------------------
def ronn_forward_ref(params, x, *, dilation_growth=2, activation="ReLU",
                     residual=False):
    def center_crop(v, length):
        s = (v.shape[-1] - length) // 2
        return v[..., s:s + length]

    for n, p in enumerate(params):
        x_in = x
        d = dilation_growth ** n
        y = jax.lax.conv_general_dilated(
            x, p["w"], window_strides=(1,), padding="VALID",
            rhs_dilation=(d,), dimension_numbers=("NCH", "OIH", "NCH"))
        y = y + p["b"][None, :, None]
        y = _apply_activation(y, activation)
        if residual:
            y = y + center_crop(x_in, y.shape[-1])
        x = y
    return x


if __name__ == "__main__":
    # Small config consistent with the module's __init__ / forward defaults.
    N, n_inputs, n_outputs = 2, 4, 4
    n_layers, n_channels, kernel_size = 3, 8, 3
    dilation_growth = 2
    L = 64

    key = jax.random.PRNGKey(0)
    key, kx = jax.random.split(key)
    x = jax.random.normal(kx, (N, n_inputs, L), dtype=jnp.float32)

    params = init_ronn_params(
        key, n_inputs=n_inputs, n_outputs=n_outputs, n_layers=n_layers,
        n_channels=n_channels, kernel_size=kernel_size)

    ref = jax.block_until_ready(
        ronn_forward_ref(params, x, dilation_growth=dilation_growth))

    # Exact-path check (f32 MXU operands) against the XLA reference.
    out_f32 = jax.block_until_ready(
        ronn_forward(params, x, dilation_growth=dilation_growth,
                     activation="ReLU", residual=False,
                     compute_dtype=jnp.float32))
    assert out_f32.shape == ref.shape, (out_f32.shape, ref.shape)
    np.testing.assert_allclose(np.asarray(out_f32), np.asarray(ref),
                               rtol=2e-3, atol=2e-3)

    # Fast path: bf16 MXU operands, f32 accumulation (default).  N(0,1) weights make
    # activations grow to O(100), so tolerances reflect bf16 operand rounding.
    out_bf16 = jax.block_until_ready(
        ronn_forward(params, x, dilation_growth=dilation_growth,
                     activation="ReLU", residual=False))
    assert out_bf16.shape == ref.shape
    np.testing.assert_allclose(np.asarray(out_bf16), np.asarray(ref),
                               rtol=5e-2, atol=1.0)

    # Multi-tile path: exercises the double-buffered (prime + prefetch) input DMA
    # and the "arbitrary" tile axis with a partial last tile.
    key, kx2 = jax.random.split(key)
    x_long = jax.random.normal(kx2, (N, n_inputs, 1024), dtype=jnp.float32)
    ref_long = jax.block_until_ready(
        ronn_forward_ref(params, x_long, dilation_growth=dilation_growth))
    out_long = jax.block_until_ready(
        ronn_forward(params, x_long, dilation_growth=dilation_growth,
                     activation="ReLU", residual=False,
                     compute_dtype=jnp.float32, tile_l=256))
    assert out_long.shape == ref_long.shape, (out_long.shape, ref_long.shape)
    np.testing.assert_allclose(np.asarray(out_long), np.asarray(ref_long),
                               rtol=2e-3, atol=2e-3)

    print("KERNEL_OK")
</pallas_src>

<mosaic_0001>
module attributes {stable_mosaic.version = 11 : i64} {
  func.func @_fused_ronn_kernel(%arg0: i32, %arg1: i32, %arg2: memref<2x4x256xf32, #tpu.memory_space<any>>, %arg3: memref<3x8x4xf32, #tpu.memory_space<vmem>>, %arg4: memref<3x8x8xf32, #tpu.memory_space<vmem>>, %arg5: memref<3x4x8xf32, #tpu.memory_space<vmem>>, %arg6: memref<8x1xf32, #tpu.memory_space<vmem>>, %arg7: memref<8x1xf32, #tpu.memory_space<vmem>>, %arg8: memref<4x1xf32, #tpu.memory_space<vmem>>, %arg9: memref<1x4x128xf32, #tpu.memory_space<vmem>>, %arg10: memref<2x4x256xf32, #tpu.memory_space<vmem>>, %arg11: memref<2x!tpu.dma_semaphore, #tpu.memory_space<semaphore_mem>>) attributes {dimension_semantics = [#tpu.dimension_semantics<parallel>, #tpu.dimension_semantics<parallel>], iteration_bounds = array<i64: 2, 1>, scalar_prefetch = 0 : i64, scratch_operands = 2 : i64, tpu.core_type = #tpu.core_type<tc>, window_params = [{}, {pipeline_mode = #tpu.pipeline_mode<synchronous>, transform_indices = @transform_1, window_bounds = array<i64: 3, 8, 4>}, {pipeline_mode = #tpu.pipeline_mode<synchronous>, transform_indices = @transform_2, window_bounds = array<i64: 3, 8, 8>}, {pipeline_mode = #tpu.pipeline_mode<synchronous>, transform_indices = @transform_3, window_bounds = array<i64: 3, 4, 8>}, {pipeline_mode = #tpu.pipeline_mode<synchronous>, transform_indices = @transform_4, window_bounds = array<i64: 8, 1>}, {pipeline_mode = #tpu.pipeline_mode<synchronous>, transform_indices = @transform_5, window_bounds = array<i64: 8, 1>}, {pipeline_mode = #tpu.pipeline_mode<synchronous>, transform_indices = @transform_6, window_bounds = array<i64: 4, 1>}, {transform_indices = @transform_7, window_bounds = array<i64: 1, 4, 128>}]} {
    %c2_i32 = arith.constant 2 : i32
    %c0_i32 = arith.constant 0 : i32
    %0 = arith.cmpi eq, %c2_i32, %c0_i32 : i32
    %c1_i32 = arith.constant 1 : i32
    %1 = arith.select %0, %c1_i32, %c2_i32 : i32
    %2 = arith.remsi %arg1, %1 : i32
    %c0_i32_0 = arith.constant 0 : i32
    %3 = arith.cmpi ne, %2, %c0_i32_0 : i32
    %c0_i32_1 = arith.constant 0 : i32
    %4 = arith.cmpi slt, %2, %c0_i32_1 : i32
    %c0_i32_2 = arith.constant 0 : i32
    %5 = arith.cmpi slt, %1, %c0_i32_2 : i32
    %6 = arith.xori %4, %5 : i1
    %7 = arith.andi %6, %3 : i1
    %8 = arith.addi %2, %1 : i32
    %9 = arith.select %7, %8, %2 : i32
    %c0_i32_3 = arith.constant 0 : i32
    %10 = arith.cmpi eq, %arg1, %c0_i32_3 : i32
    %11 = arith.extui %10 : i1 to i32
    %c0_i32_4 = arith.constant 0 : i32
    %12 = arith.cmpi ne, %11, %c0_i32_4 : i32
    scf.if %12 {
      %c0_i32_57 = arith.constant 0 : i32
      %89 = tpu.assume_multiple %c0_i32_57, 128 : i32
      %c0_i32_58 = arith.constant 0 : i32
      %c0_i32_59 = arith.constant 0 : i32
      %c0_i32_60 = arith.constant 0 : i32
      %90 = tpu.memref_slice %arg2[%arg0, %c0_i32_60, %89] : memref<2x4x256xf32, #tpu.memory_space<any>> -> memref<1x4x256xf32, #tpu.memory_space<any>>
      %91 = tpu.memref_squeeze %90 : memref<1x4x256xf32, #tpu.memory_space<any>> -> memref<4x256xf32, #tpu.memory_space<any>>
      %c0_i32_61 = arith.constant 0 : i32
      %c0_i32_62 = arith.constant 0 : i32
      %92 = tpu.memref_slice %arg10[%c0_i32_58, %c0_i32_61, %c0_i32_62] : memref<2x4x256xf32, #tpu.memory_space<vmem>> -> memref<1x4x256xf32, #tpu.memory_space<vmem>>
      %93 = tpu.memref_squeeze %92 : memref<1x4x256xf32, #tpu.memory_space<vmem>> -> memref<4x256xf32, #tpu.memory_space<vmem>>
      %94 = tpu.memref_slice %arg11[%c0_i32_59] : memref<2x!tpu.dma_semaphore, #tpu.memory_space<semaphore_mem>> -> memref<1x!tpu.dma_semaphore, #tpu.memory_space<semaphore_mem>>
      %95 = tpu.memref_squeeze %94 : memref<1x!tpu.dma_semaphore, #tpu.memory_space<semaphore_mem>> -> memref<!tpu.dma_semaphore, #tpu.memory_space<semaphore_mem>>
      tpu.enqueue_dma source(%91 : memref<4x256xf32, #tpu.memory_space<any>>) target(%93 : memref<4x256xf32, #tpu.memory_space<vmem>>) target_semaphore(%95 : memref<!tpu.dma_semaphore, #tpu.memory_space<semaphore_mem>>)
    } else {
    }
    %c1_i32_5 = arith.constant 1 : i32
    %13 = arith.addi %arg1, %c1_i32_5 : i32
    %c1_i32_6 = arith.constant 1 : i32
    %14 = arith.cmpi slt, %13, %c1_i32_6 : i32
    %15 = arith.extui %14 : i1 to i32
    %c0_i32_7 = arith.constant 0 : i32
    %16 = arith.cmpi ne, %15, %c0_i32_7 : i32
    scf.if %16 {
      %c1_i32_57 = arith.constant 1 : i32
      %89 = arith.addi %arg1, %c1_i32_57 : i32
      %c1_i32_58 = arith.constant 1 : i32
      %90 = arith.subi %c1_i32_58, %9 : i32
      %c128_i32_59 = arith.constant 128 : i32
      %91 = arith.muli %89, %c128_i32_59 : i32
      %92 = tpu.assume_multiple %91, 128 : i32
      %c0_i32_60 = arith.constant 0 : i32
      %93 = tpu.memref_slice %arg2[%arg0, %c0_i32_60, %92] : memref<2x4x256xf32, #tpu.memory_space<any>> -> memref<1x4x256xf32, #tpu.memory_space<any>>
      %94 = tpu.memref_squeeze %93 : memref<1x4x256xf32, #tpu.memory_space<any>> -> memref<4x256xf32, #tpu.memory_space<any>>
      %c0_i32_61 = arith.constant 0 : i32
      %c0_i32_62 = arith.constant 0 : i32
      %95 = tpu.memref_slice %arg10[%90, %c0_i32_61, %c0_i32_62] : memref<2x4x256xf32, #tpu.memory_space<vmem>> -> memref<1x4x256xf32, #tpu.memory_space<vmem>>
      %96 = tpu.memref_squeeze %95 : memref<1x4x256xf32, #tpu.memory_space<vmem>> -> memref<4x256xf32, #tpu.memory_space<vmem>>
      %97 = tpu.memref_slice %arg11[%90] : memref<2x!tpu.dma_semaphore, #tpu.memory_space<semaphore_mem>> -> memref<1x!tpu.dma_semaphore, #tpu.memory_space<semaphore_mem>>
      %98 = tpu.memref_squeeze %97 : memref<1x!tpu.dma_semaphore, #tpu.memory_space<semaphore_mem>> -> memref<!tpu.dma_semaphore, #tpu.memory_space<semaphore_mem>>
      tpu.enqueue_dma source(%94 : memref<4x256xf32, #tpu.memory_space<any>>) target(%96 : memref<4x256xf32, #tpu.memory_space<vmem>>) target_semaphore(%98 : memref<!tpu.dma_semaphore, #tpu.memory_space<semaphore_mem>>)
    } else {
    }
    %c128_i32 = arith.constant 128 : i32
    %17 = arith.muli %arg1, %c128_i32 : i32
    %18 = tpu.assume_multiple %17, 128 : i32
    %c0_i32_8 = arith.constant 0 : i32
    %19 = tpu.memref_slice %arg2[%arg0, %c0_i32_8, %18] : memref<2x4x256xf32, #tpu.memory_space<any>> -> memref<1x4x256xf32, #tpu.memory_space<any>>
    %20 = tpu.memref_squeeze %19 : memref<1x4x256xf32, #tpu.memory_space<any>> -> memref<4x256xf32, #tpu.memory_space<any>>
    %c0_i32_9 = arith.constant 0 : i32
    %c0_i32_10 = arith.constant 0 : i32
    %21 = tpu.memref_slice %arg10[%9, %c0_i32_9, %c0_i32_10] : memref<2x4x256xf32, #tpu.memory_space<vmem>> -> memref<1x4x256xf32, #tpu.memory_space<vmem>>
    %22 = tpu.memref_squeeze %21 : memref<1x4x256xf32, #tpu.memory_space<vmem>> -> memref<4x256xf32, #tpu.memory_space<vmem>>
    %23 = tpu.memref_slice %arg11[%9] : memref<2x!tpu.dma_semaphore, #tpu.memory_space<semaphore_mem>> -> memref<1x!tpu.dma_semaphore, #tpu.memory_space<semaphore_mem>>
    %24 = tpu.memref_squeeze %23 : memref<1x!tpu.dma_semaphore, #tpu.memory_space<semaphore_mem>> -> memref<!tpu.dma_semaphore, #tpu.memory_space<semaphore_mem>>
    tpu.wait_dma2 semaphore(%24 : memref<!tpu.dma_semaphore, #tpu.memory_space<semaphore_mem>>) src(%20 : memref<4x256xf32, #tpu.memory_space<any>>) dst(%22 : memref<4x256xf32, #tpu.memory_space<vmem>>)
    %25 = arith.index_cast %9 : i32 to index
    %c0 = arith.constant 0 : index
    %c0_11 = arith.constant 0 : index
    %26 = vector.load %arg10[%25, %c0, %c0_11] : memref<2x4x256xf32, #tpu.memory_space<vmem>>, vector<1x4x256xf32>
    %27 = vector.shape_cast %26 : vector<1x4x256xf32> to vector<4x256xf32>
    %c0_12 = arith.constant 0 : index
    %c0_13 = arith.constant 0 : index
    %c0_14 = arith.constant 0 : index
    %28 = vector.load %arg3[%c0_12, %c0_13, %c0_14] : memref<3x8x4xf32, #tpu.memory_space<vmem>>, vector<1x8x4xf32>
    %29 = vector.shape_cast %28 : vector<1x8x4xf32> to vector<8x4xf32>
    %30 = vector.extract_strided_slice %27 {offsets = [0, 0], sizes = [4, 254], strides = [1, 1]} : vector<4x256xf32> to vector<4x254xf32>
    %cst = arith.constant dense<0.000000e+00> : vector<8x254xf32>
    %31 = tpu.matmul %29, %30, %cst {dimension_numbers = #tpu.dot_dimension_numbers<[1], [0], [0], [1], [0, 0, 1, 1], [], []>} : vector<8x4xf32>, vector<4x254xf32>, vector<8x254xf32> -> vector<8x254xf32>
    %c1 = arith.constant 1 : index
    %c0_15 = arith.constant 0 : index
    %c0_16 = arith.constant 0 : index
    %32 = vector.load %arg3[%c1, %c0_15, %c0_16] : memref<3x8x4xf32, #tpu.memory_space<vmem>>, vector<1x8x4xf32>
    %33 = vector.shape_cast %32 : vector<1x8x4xf32> to vector<8x4xf32>
    %34 = vector.extract_strided_slice %27 {offsets = [0, 1], sizes = [4, 254], strides = [1, 1]} : vector<4x256xf32> to vector<4x254xf32>
    %cst_17 = arith.constant dense<0.000000e+00> : vector<8x254xf32>
    %35 = tpu.matmul %33, %34, %cst_17 {dimension_numbers = #tpu.dot_dimension_numbers<[1], [0], [0], [1], [0, 0, 1, 1], [], []>} : vector<8x4xf32>, vector<4x254xf32>, vector<8x254xf32> -> vector<8x254xf32>
    %36 = arith.addf %31, %35 : vector<8x254xf32>
    %c2 = arith.constant 2 : index
    %c0_18 = arith.constant 0 : index
    %c0_19 = arith.constant 0 : index
    %37 = vector.load %arg3[%c2, %c0_18, %c0_19] : memref<3x8x4xf32, #tpu.memory_space<vmem>>, vector<1x8x4xf32>
    %38 = vector.shape_cast %37 : vector<1x8x4xf32> to vector<8x4xf32>
    %39 = vector.extract_strided_slice %27 {offsets = [0, 2], sizes = [4, 254], strides = [1, 1]} : vector<4x256xf32> to vector<4x254xf32>
    %cst_20 = arith.constant dense<0.000000e+00> : vector<8x254xf32>
    %40 = tpu.matmul %38, %39, %cst_20 {dimension_numbers = #tpu.dot_dimension_numbers<[1], [0], [0], [1], [0, 0, 1, 1], [], []>} : vector<8x4xf32>, vector<4x254xf32>, vector<8x254xf32> -> vector<8x254xf32>
    %41 = arith.addf %36, %40 : vector<8x254xf32>
    %c0_21 = arith.constant 0 : index
    %c0_22 = arith.constant 0 : index
    %42 = vector.load %arg6[%c0_21, %c0_22] : memref<8x1xf32, #tpu.memory_space<vmem>>, vector<8x1xf32>
    %43 = vector.broadcast %42 : vector<8x1xf32> to vector<8x254xf32>
    %44 = arith.addf %41, %43 : vector<8x254xf32>
    %cst_23 = arith.constant 0.000000e+00 : f32
    %45 = vector.broadcast %cst_23 : f32 to vector<8x254xf32>
    %46 = arith.maximumf %44, %45 : vector<8x254xf32>
    %c0_24 = arith.constant 0 : index
    %c0_25 = arith.constant 0 : index
    %c0_26 = arith.constant 0 : index
    %47 = vector.load %arg4[%c0_24, %c0_25, %c0_26] : memref<3x8x8xf32, #tpu.memory_space<vmem>>, vector<1x8x8xf32>
    %48 = vector.shape_cast %47 : vector<1x8x8xf32> to vector<8x8xf32>
    %49 = vector.extract_strided_slice %46 {offsets = [0, 0], sizes = [8, 250], strides = [1, 1]} : vector<8x254xf32> to vector<8x250xf32>
    %cst_27 = arith.constant dense<0.000000e+00> : vector<8x250xf32>
    %50 = tpu.matmul %48, %49, %cst_27 {dimension_numbers = #tpu.dot_dimension_numbers<[1], [0], [0], [1], [0, 0, 1, 1], [], []>} : vector<8x8xf32>, vector<8x250xf32>, vector<8x250xf32> -> vector<8x250xf32>
    %c1_28 = arith.constant 1 : index
    %c0_29 = arith.constant 0 : index
    %c0_30 = arith.constant 0 : index
    %51 = vector.load %arg4[%c1_28, %c0_29, %c0_30] : memref<3x8x8xf32, #tpu.memory_space<vmem>>, vector<1x8x8xf32>
    %52 = vector.shape_cast %51 : vector<1x8x8xf32> to vector<8x8xf32>
    %53 = vector.extract_strided_slice %46 {offsets = [0, 2], sizes = [8, 250], strides = [1, 1]} : vector<8x254xf32> to vector<8x250xf32>
    %cst_31 = arith.constant dense<0.000000e+00> : vector<8x250xf32>
    %54 = tpu.matmul %52, %53, %cst_31 {dimension_numbers = #tpu.dot_dimension_numbers<[1], [0], [0], [1], [0, 0, 1, 1], [], []>} : vector<8x8xf32>, vector<8x250xf32>, vector<8x250xf32> -> vector<8x250xf32>
    %55 = arith.addf %50, %54 : vector<8x250xf32>
    %c2_32 = arith.constant 2 : index
    %c0_33 = arith.constant 0 : index
    %c0_34 = arith.constant 0 : index
    %56 = vector.load %arg4[%c2_32, %c0_33, %c0_34] : memref<3x8x8xf32, #tpu.memory_space<vmem>>, vector<1x8x8xf32>
    %57 = vector.shape_cast %56 : vector<1x8x8xf32> to vector<8x8xf32>
    %58 = vector.extract_strided_slice %46 {offsets = [0, 4], sizes = [8, 250], strides = [1, 1]} : vector<8x254xf32> to vector<8x250xf32>
    %cst_35 = arith.constant dense<0.000000e+00> : vector<8x250xf32>
    %59 = tpu.matmul %57, %58, %cst_35 {dimension_numbers = #tpu.dot_dimension_numbers<[1], [0], [0], [1], [0, 0, 1, 1], [], []>} : vector<8x8xf32>, vector<8x250xf32>, vector<8x250xf32> -> vector<8x250xf32>
    %60 = arith.addf %55, %59 : vector<8x250xf32>
    %c0_36 = arith.constant 0 : index
    %c0_37 = arith.constant 0 : index
    %61 = vector.load %arg7[%c0_36, %c0_37] : memref<8x1xf32, #tpu.memory_space<vmem>>, vector<8x1xf32>
    %62 = vector.broadcast %61 : vector<8x1xf32> to vector<8x250xf32>
    %63 = arith.addf %60, %62 : vector<8x250xf32>
    %cst_38 = arith.constant 0.000000e+00 : f32
    %64 = vector.broadcast %cst_38 : f32 to vector<8x250xf32>
    %65 = arith.maximumf %63, %64 : vector<8x250xf32>
    %c0_39 = arith.constant 0 : index
    %c0_40 = arith.constant 0 : index
    %c0_41 = arith.constant 0 : index
    %66 = vector.load %arg5[%c0_39, %c0_40, %c0_41] : memref<3x4x8xf32, #tpu.memory_space<vmem>>, vector<1x4x8xf32>
    %67 = vector.shape_cast %66 : vector<1x4x8xf32> to vector<4x8xf32>
    %68 = vector.extract_strided_slice %65 {offsets = [0, 0], sizes = [8, 242], strides = [1, 1]} : vector<8x250xf32> to vector<8x242xf32>
    %cst_42 = arith.constant dense<0.000000e+00> : vector<4x242xf32>
    %69 = tpu.matmul %67, %68, %cst_42 {dimension_numbers = #tpu.dot_dimension_numbers<[1], [0], [0], [1], [0, 0, 1, 1], [], []>} : vector<4x8xf32>, vector<8x242xf32>, vector<4x242xf32> -> vector<4x242xf32>
    %c1_43 = arith.constant 1 : index
    %c0_44 = arith.constant 0 : index
    %c0_45 = arith.constant 0 : index
    %70 = vector.load %arg5[%c1_43, %c0_44, %c0_45] : memref<3x4x8xf32, #tpu.memory_space<vmem>>, vector<1x4x8xf32>
    %71 = vector.shape_cast %70 : vector<1x4x8xf32> to vector<4x8xf32>
    %72 = vector.extract_strided_slice %65 {offsets = [0, 4], sizes = [8, 242], strides = [1, 1]} : vector<8x250xf32> to vector<8x242xf32>
    %cst_46 = arith.constant dense<0.000000e+00> : vector<4x242xf32>
    %73 = tpu.matmul %71, %72, %cst_46 {dimension_numbers = #tpu.dot_dimension_numbers<[1], [0], [0], [1], [0, 0, 1, 1], [], []>} : vector<4x8xf32>, vector<8x242xf32>, vector<4x242xf32> -> vector<4x242xf32>
    %74 = arith.addf %69, %73 : vector<4x242xf32>
    %c2_47 = arith.constant 2 : index
    %c0_48 = arith.constant 0 : index
    %c0_49 = arith.constant 0 : index
    %75 = vector.load %arg5[%c2_47, %c0_48, %c0_49] : memref<3x4x8xf32, #tpu.memory_space<vmem>>, vector<1x4x8xf32>
    %76 = vector.shape_cast %75 : vector<1x4x8xf32> to vector<4x8xf32>
    %77 = vector.extract_strided_slice %65 {offsets = [0, 8], sizes = [8, 242], strides = [1, 1]} : vector<8x250xf32> to vector<8x242xf32>
    %cst_50 = arith.constant dense<0.000000e+00> : vector<4x242xf32>
    %78 = tpu.matmul %76, %77, %cst_50 {dimension_numbers = #tpu.dot_dimension_numbers<[1], [0], [0], [1], [0, 0, 1, 1], [], []>} : vector<4x8xf32>, vector<8x242xf32>, vector<4x242xf32> -> vector<4x242xf32>
    %79 = arith.addf %74, %78 : vector<4x242xf32>
    %c0_51 = arith.constant 0 : index
    %c0_52 = arith.constant 0 : index
    %80 = vector.load %arg8[%c0_51, %c0_52] : memref<4x1xf32, #tpu.memory_space<vmem>>, vector<4x1xf32>
    %81 = vector.broadcast %80 : vector<4x1xf32> to vector<4x242xf32>
    %82 = arith.addf %79, %81 : vector<4x242xf32>
    %cst_53 = arith.constant 0.000000e+00 : f32
    %83 = vector.broadcast %cst_53 : f32 to vector<4x242xf32>
    %84 = arith.maximumf %82, %83 : vector<4x242xf32>
    %85 = vector.extract_strided_slice %84 {offsets = [0, 0], sizes = [4, 128], strides = [1, 1]} : vector<4x242xf32> to vector<4x128xf32>
    %c0_54 = arith.constant 0 : index
    %c0_55 = arith.constant 0 : index
    %c0_56 = arith.constant 0 : index
    %86 = vector.load %arg9[%c0_54, %c0_55, %c0_56] : memref<1x4x128xf32, #tpu.memory_space<vmem>>, vector<1x4x128xf32>
    %87 = vector.shape_cast %86 : vector<1x4x128xf32> to vector<4x128xf32>
    %88 = vector.shape_cast %85 : vector<4x128xf32> to vector<1x4x128xf32>
    tpu.vector_store %arg9[%c0_54, %c0_55, %c0_56], %88 {strides = array<i32>} : memref<1x4x128xf32, #tpu.memory_space<vmem>>, vector<1x4x128xf32>,
    return
  }
  func.func @transform_1(%arg0: i32, %arg1: i32) -> (i32, i32, i32) {
    %c0_i32 = arith.constant 0 : i32
    %c0_i32_0 = arith.constant 0 : i32
    %c0_i32_1 = arith.constant 0 : i32
    %c0_i32_2 = arith.constant 0 : i32
    return %c0_i32, %c0_i32_0, %c0_i32_1 : i32, i32, i32
  }
  func.func @transform_2(%arg0: i32, %arg1: i32) -> (i32, i32, i32) {
    %c0_i32 = arith.constant 0 : i32
    %c0_i32_0 = arith.constant 0 : i32
    %c0_i32_1 = arith.constant 0 : i32
    %c0_i32_2 = arith.constant 0 : i32
    return %c0_i32, %c0_i32_0, %c0_i32_1 : i32, i32, i32
  }
  func.func @transform_3(%arg0: i32, %arg1: i32) -> (i32, i32, i32) {
    %c0_i32 = arith.constant 0 : i32
    %c0_i32_0 = arith.constant 0 : i32
    %c0_i32_1 = arith.constant 0 : i32
    %c0_i32_2 = arith.constant 0 : i32
    return %c0_i32, %c0_i32_0, %c0_i32_1 : i32, i32, i32
  }
  func.func @transform_4(%arg0: i32, %arg1: i32) -> (i32, i32) {
    %c0_i32 = arith.constant 0 : i32
    %c0_i32_0 = arith.constant 0 : i32
    %c0_i32_1 = arith.constant 0 : i32
    return %c0_i32, %c0_i32_0 : i32, i32
  }
  func.func @transform_5(%arg0: i32, %arg1: i32) -> (i32, i32) {
    %c0_i32 = arith.constant 0 : i32
    %c0_i32_0 = arith.constant 0 : i32
    %c0_i32_1 = arith.constant 0 : i32
    return %c0_i32, %c0_i32_0 : i32, i32
  }
  func.func @transform_6(%arg0: i32, %arg1: i32) -> (i32, i32) {
    %c0_i32 = arith.constant 0 : i32
    %c0_i32_0 = arith.constant 0 : i32
    %c0_i32_1 = arith.constant 0 : i32
    return %c0_i32, %c0_i32_0 : i32, i32
  }
  func.func @transform_7(%arg0: i32, %arg1: i32) -> (i32, i32, i32) {
    %c0_i32 = arith.constant 0 : i32
    %c0_i32_0 = arith.constant 0 : i32
    return %arg0, %c0_i32, %arg1 : i32, i32, i32
  }
}

</mosaic_0001>

<bundles_post_ra>
// kernel: tpu_custom_call.1
= control target key start
LH: loop header
LB: loop body
LE: loop exit
PB: predicated region body
PF: predicated region fallthrough
CT: control target
= control target key end

     0   :  { %12 = vsyncpa [#allocation5], 0  ;;  %s1699_s0 = inlined_call_operand.vmem [shape: f32[2,4,256], index: 0, kind: input, shape index: {}]   ;;  %s1700_s1 = inlined_call_operand.vmem [shape: f32[3,8,4], index: 1, kind: input, shape index: {}]   ;;  %s1701_s2 = inlined_call_operand.vmem [shape: f32[3,8,8], index: 2, kind: input, shape index: {}]   ;;  %s1702_s3 = inlined_call_operand.vmem [shape: f32[3,4,8], index: 3, kind: input, shape index: {}]   ;;  %s1703_s4 = inlined_call_operand.vmem [shape: f32[8,1], index: 4, kind: input, shape index: {}]   ;;  %s1704_s5 = inlined_call_operand.vmem [shape: f32[8,1], index: 5, kind: input, shape index: {}]   ;;  %s1705_s6 = inlined_call_operand.vmem [shape: f32[4,1], index: 6, kind: input, shape index: {}]   ;;  %s1706_s7 = inlined_call_operand.hbm [shape: f32[2,4,128], index: 7, kind: output, shape index: {}]  }
   0x1   :  { %14 = vsyncpa [#allocation5 + $0x1], 0  ;;  %s1505_s24 = smov 0   ;;  %s1507_s25 = smov 0  }
   0x2   :  { %s1509_s26 = smov 0   ;;  %s1511_s27 = smov 0  }
   0x3   :  { %s1513_s28 = smov 0   ;;  %s1515_s29 = smov 0  }
   0x4 LB: > { %s1264_s30 = sadd.s32 4294967295, %s1456_s29   ;;  %s1265_s8 = sadd.s32 4294967294, %s1456_s29   ;;  %s1456_s29 = sphi %s1515_s29, %s20_s29   ;;  %s1452_s28 = sphi %s1513_s28, %s1713_s28   ;;  %s1448_s27 = sphi %s1511_s27, %s1712_s27   ;;  %s1444_s26 = sphi %s1509_s26, %s1711_s26   ;;  %s1440_s25 = sphi %s1507_s25, %s1710_s25   ;;  %s1436_s24 = sphi %s1505_s24, %s1709_s24  }
   0x5   : > { %s32_s9 = sadd.s32 1, %s1452_s28  ;;  %s167_s10 = sadd.s32 1, %s1444_s26 }
   0x6   : > { %p34_p0 = scmp.ge.s32.totalorder %s32_s9, 2  ;;  %p177_p1 = scmp.ne.s32.totalorder %s1444_s26, %s1440_s25 }
   0x7   : > { %p178_p2 = scmp.eq.s32.totalorder %s1264_s30, 1  ;;  %p183_p3 = scmp.ne.s32.totalorder %s1440_s25, %s1436_s24 }
   0x8   : > { %s1715_s9 = smov (%p34_p0, %s32_s9), 0  ;;  %p184_p5 = scmp.eq.s32.totalorder %s1265_s8, 1 }
   0x9   : > { %p1545_p4 = por %p178_p2, %p177_p1  ;;  %s162_s12 = ssub.s32 %s1452_s28, %s1715_s9 }
   0xa   : > { %p1267_p6 = scmp.ge.s32.totalorder %s1456_s29, 1  ;;  %p165_p7 = scmp.eq.s32.totalorder %s162_s12, 0 }
   0xb   : > { %p1552_p8 = por %p184_p5, %p183_p3  ;;  %p220_p9 = scmp.lt.s32.totalorder %s1456_s29, 3 }
   0xc   : > { %s1558_s14 = scalar_select %p165_p7, %s1444_s26, %s167_s10  }
   0xd   : > { %p221_p10 = pnand %p1267_p6, %p220_p9 }
   0xe   : > { %s242_s15 = sand.u32 (!%p221_p10), 1, %s1440_s25   ;;  %s1302_s16 = sshll.u32 (!%p221_p10), %s1448_s27, 3 }
   0xf   : > { %224 = sbr.rel (%p221_p10) target bundleno = 1085 (0x43d), region = 44  ;;  %s1564_s17 = sshll.u32 (!%p221_p10), %s242_s15, 2 }
  0x10   : > { %s264_s20 = scalar_lea.vmem (!%p221_p10), %s1699_s0, %s1302_s16  ;;  %s244_s21 = scalar_lea.vmem (!%p221_p10), [#allocation4], %s1564_s17 }
  0x11   : > { %v297_v0 = vld [vmem:[%s264_s20] sm:$0xff] (!%p221_p10) }
  0x16   : > { %306 = vsyncadd [#allocation3], 128 }
  0x17   : > { %1428 = dma.done.wait [#allocation3], 128 }
  0x18   : > { %1429 = vsyncadd [#allocation3], 4294967168  ;;  %s1458_s22 = smov 127   ;;  %v380_v1 = vcombine.high %v297_v0, %v297_v0  ;;  %s1459_s23 = smov 126   ;;  %v1460_v2 = vmov 0.0   ;;  %v633_v3 = vld [vmem:[%s1703_s4] sm:$0xff] }
  0x19   : > { %381 = vrot.lane.b32.xlu0 %v297_v0, %s1458_s22  ;;  %547 = vrot.lane.b32.xlu1 %v297_v0, %s1459_s23  ;;  %v1461_v4 = vmov 0   ;;  %vm391_vm0 = vcmask 1043456   ;;  %vm385_vm1 = vcmask 1039360   ;;  %v1275_v8 = vld [vmem:[%s1700_s1 + $0x8] sm:$0xff]  ;;  %vm387_vm2 = vcmask 31744   ;;  %v376_v11 = vld [vmem:[%s1700_s1] sm:$0xff] }
  0x1a   : > { %460 = vmatprep.mubr.f32.mxu0 %v1460_v2  ;;  %723 = vmatprep.mubr.f32.mxu1 %v1460_v2  ;;  %vm551_vm3 = vcmask 1031168   ;;  %v1282_v13 = vld [vmem:[%s1700_s1 + $0x10] sm:$0xff]  ;;  %v890_v20 = vld [vmem:[%s1704_s5] sm:$0xff]  ;;  %v1286_v24 = vld [vmem:[%s1701_s2 + $0x8] sm:$0xff]  ;;  %vm655_vm4 = vcmask 64512   ;;  %vm810_vm5 = vcmask 1014784  }
  0x1b   : > { %1374 = vset.pattern.permute.xlu0 %v1461_v4  ;;  %1375 = vset.pattern.permute.xlu1 %v1461_v4  ;;  %v643_v27 = vld [vmem:[%s1701_s2] sm:$0xff]  ;;  %v1289_v30 = vld [vmem:[%s1701_s2 + $0x10] sm:$0xff]  ;;  %s1463_s8 = smov 120   ;;  %vm1064_vm6 = vcmask 982016   ;;  %v1294_v46 = vld [vmem:[%s1702_s3 + $0x8] sm:$0xf] }
  0x1c   : > { %v900_v38 = vld [vmem:[%s1702_s3] sm:$0xf]  ;;  %v1291_v42 = vld [vmem:[%s1702_s3 + $0x4] sm:$0xf]  ;;  %s1297_s19 = sshll.u32 %s1448_s27, 6  ;;  %s1166_s20 = sshll.u32 %s244_s21, 4  ;;  %s1650_s20 = int_to_ptr.vmem [resolvable:$true] %s1166_s20 }
  0x1d   : > { %383 = vrot.lane.b32.xlu0 %v380_v1, %s1458_s22  ;;  %549 = vrot.lane.b32.xlu1 %v380_v1, %s1459_s23  ;;  %s1462_s22 = smov 124   ;;  %v1142_v39 = vld [vmem:[%s1705_s6] sm:$0xf]  ;;  %s1648_s10 = scalar_lea.hbm %s1706_s7, %s1297_s19 }
  0x1e   : > { %s1152_s12 = scalar_lea.sflag [#allocation5], %s242_s15  ;;  %s1464_s27 = smov [#allocation4]  }
  0x1f   : > { %s1380_s16 = sshll.u32 %s1464_s27, 4  ;;  %s1381_s16 = int_to_ptr.vmem [resolvable:$false] %s1380_s16 }
  0x20   : > { %p1383_p0 = scmp.lt.s32.totalorder %s1650_s20, %s1381_s16 }
  0x21   : > { %636 = vperm.xlu0 %1374, %v633_v3  }
  0x8b   : > { %v382_v5 = vpop.permute.xlu0 %381  ;;  %v548_v6 = vpop.permute.xlu1 %547 }
  0x8f   : > { %v384_v7 = vpop.permute.xlu0 %383  ;;  %v550_v10 = vpop.permute.xlu1 %549 }
  0x90   : > { %1276 = vmatprep.subr.msk.mxu0 %vm391_vm0, %v384_v7  ;;  %v386_v9 = vsel %vm385_vm1, %v382_v5, %v384_v7  ;;  %v552_v12 = vsel %vm551_vm3, %v548_v6, %v550_v10 }
  0x91   : > { %1277 = vmatpush1.msk.msra.mxu0 %vm391_vm0, %v386_v9 }
  0x92   : > { %1278 = vmatmul.mubr.msk.f32.vlgmr.msra.gmra.mrb[0].mxu0 %vm387_vm2, %v1275_v8  ;;  %1279 = vmatprep.subr.msk.mxu0 %vm391_vm0, %v380_v1 }
  0x93   : > { %1280 = vmatpush1.msk.msra.mxu0 %vm391_vm0, %v297_v0  ;;  %538 = vmatprep.mubr.f32.mxu0 %v1460_v2 }
  0x94   : > { %1283 = vmatprep.subr.msk.mxu0 %vm391_vm0, %v550_v10 }
  0x9a   : > { %1281 = vmatmul.mubr.msk.f32.vlgmr.msra.gmra.mrb[0].mxu0 %vm387_vm2, %v376_v11 }
  0x9b   : > { %1284 = vmatpush1.msk.msra.mxu0 %vm391_vm0, %v552_v12  ;;  %624 = vmatprep.mubr.f32.mxu0 %v1460_v2 }
  0xa0   : > { %v637_v14 = vpop.permute.xlu0 %636 }
  0xa2   : > { %1285 = vmatmul.mubr.msk.f32.vlgmr.msra.gmra.mrb[0].mxu0 %vm387_vm2, %v1282_v13 }
  0xa3   : > { %979 = vmatprep.mubr.f32.mxu0 %v1460_v2 }
 0x175   : > { %v626_v15 = vpop.f32.mrb[0].mxu0 }
 0x176   : > { %v639_v16 = vadd.f32 %v637_v14, %v626_v15  ;;  %v628_v17 = vpop.f32.mrb[1].mxu0 }
 0x177   : > { %v640_v19 = vadd.f32 %v637_v14, %v628_v17 }
 0x178   : > { %v641_v18 = vmax.f32 %v639_v16, 0.0 }
 0x179   : > { %v642_v21 = vmax.f32 %v640_v19, 0.0 }
 0x17a   : > { %806 = vrot.lane.b32.xlu0 %v641_v18, %s1462_s22  ;;  %648 = vrot.lane.b32.xlu1 %v641_v18, %s1459_s23 }
 0x17e   : > { %893 = vperm.xlu0 %1374, %v890_v20   ;;  %650 = vrot.lane.b32.xlu1 %v642_v21, %s1459_s23  ;;  %s1376_s23 = scalar_lea.vmem %s1650_s20, 64 }
 0x17f   : > { %p1377_p11 = scmp.ne.s32.totalorder %s1650_s20, %s1376_s23 }
 0x181   : > { %p1378_p12 = pnand %p1377_p11, %p1545_p4 }
 0x182   : > { %808 = vrot.lane.b32.xlu1 %v642_v21, %s1462_s22 }
 0x183   : > { %p1379_p13 = pneg %p1378_p12 }
 0x1ec   : > { %v649_v22 = vpop.permute.xlu1 %648  ;;  %v807_v28 = vpop.permute.xlu0 %806 }
 0x1f0   : > { %v651_v23 = vpop.permute.xlu1 %650 }
 0x1f1   : > { %659 = vmatprep.subr.mxu1 %v651_v23  ;;  %v652_v25 = vsel %vm551_vm3, %v649_v22, %v651_v23 }
 0x1f2   : > { %660 = vmatpush1.msra.mxu1 %v652_v25 }
 0x1f3   : > { %1287 = vmatmul.mubr.msk.f32.vlgmr.msra.gmra.mrb[0].mxu1 %vm655_vm4, %v1286_v24  ;;  %733 = vmatprep.subr.mxu1 %v642_v21 }
 0x1f4   : > { %734 = vmatpush1.msra.mxu1 %v641_v18  ;;  %v809_v26 = vpop.permute.xlu1 %808  ;;  %797 = vmatprep.mubr.f32.mxu1 %v1460_v2 }
 0x1f5   : > { %817 = vmatprep.subr.mxu1 %v809_v26  ;;  %v811_v29 = vsel %vm810_vm5, %v807_v28, %v809_v26 }
 0x1fb   : > { %1288 = vmatmul.mubr.msk.f32.vlgmr.msra.gmra.mrb[0].mxu1 %vm655_vm4, %v643_v27 }
 0x1fc   : > { %818 = vmatpush1.msra.mxu1 %v811_v29  ;;  %881 = vmatprep.mubr.f32.mxu1 %v1460_v2 }
 0x1fd   : > { %v894_v31 = vpop.permute.xlu0 %893 }
 0x203   : > { %1290 = vmatmul.mubr.msk.f32.vlgmr.msra.gmra.mrb[0].mxu1 %vm655_vm4, %v1289_v30 }
 0x204   : > { %1052 = vmatprep.mubr.f32.mxu1 %v1460_v2 }
 0x2d6   : > { %v883_v32 = vpop.f32.mrb[0].mxu1 }
 0x2d7   : > { %v896_v33 = vadd.f32 %v894_v31, %v883_v32  ;;  %v885_v34 = vpop.f32.mrb[1].mxu1 }
 0x2d8   : > { %v897_v35 = vadd.f32 %v894_v31, %v885_v34 }
 0x2d9   : > { %v898_v36 = vmax.f32 %v896_v33, 0.0 }
 0x2da   : > { %v899_v37 = vmax.f32 %v897_v35, 0.0 }
 0x2db   : > { %905 = vrot.lane.b32.xlu1 %v898_v36, %s1462_s22 }
 0x2dc   : > { %907 = vrot.lane.b32.xlu0 %v899_v37, %s1462_s22  ;;  %988 = vmatprep.subr.mxu1 %v899_v37  ;;  %s1382_s22 = scalar_lea.vmem %s1381_s16, 128 }
 0x2dd   : > { %989 = vmatpush1.msra.mxu1 %v898_v36  ;;  %p1384_p1 = scmp.lt.s32.totalorder %s1382_s22, %s1376_s23 }
 0x2de   : > { %1293 = vmatmul.mubr.msk.f32.vlgmr.msra.gmra.mrb[2].mxu1 %vm655_vm4, %v900_v38 }
 0x2df   : > { %1060 = vrot.lane.b32.xlu1 %v898_v36, %s1463_s8  ;;  %p1385_p2 = por %p1384_p1, %p1383_p0 }
 0x2e0   : > { %1062 = vrot.lane.b32.xlu0 %v899_v37, %s1463_s8 }
 0x2e1   : > { %p1386_p3 = pnand %p1385_p2, %p1379_p13 }
 0x2e3   : > { %1145 = vperm.xlu1 %1375, %v1142_v39  }
 0x34d   : > { %v906_v40 = vpop.permute.xlu1 %905 }
 0x34e   : > { %v908_v41 = vpop.permute.xlu0 %907 }
 0x34f   : > { %v909_v43 = vsel %vm810_vm5, %v906_v40, %v908_v41  ;;  %915 = vmatprep.subr.mxu0 %v908_v41 }
 0x350   : > { %916 = vmatpush1.msra.mxu0 %v909_v43 }
 0x351   : > { %v1061_v44 = vpop.permute.xlu1 %1060  ;;  %1292 = vmatmul.mubr.msk.f32.vlgmr.msra.gmra.mrb[2].mxu0 %vm655_vm4, %v1291_v42 }
 0x352   : > { %v1063_v45 = vpop.permute.xlu0 %1062  ;;  %1135 = vmatprep.mubr.f32.mxu0 %v1460_v2 }
 0x353   : > { %v1065_v47 = vsel %vm1064_vm6, %v1061_v44, %v1063_v45  ;;  %1071 = vmatprep.subr.mxu0 %v1063_v45 }
 0x354   : > { %1072 = vmatpush1.msra.mxu0 %v1065_v47 }
 0x355   : > { %1295 = vmatmul.mubr.msk.f32.vlgmr.msra.gmra.mrb[4].mxu0 %vm655_vm4, %v1294_v46 }
 0x362   : > { %v1146_v54 = vpop.permute.xlu1 %1145 }
 0x3b1   : > { %v1054_v48 = vpop.f32.mrb[2].mxu1 }
 0x3b2   : > { %v1056_v49 = vpop.f32.mrb[3].mxu1 }
 0x424   : > { %v981_v50 = vpop.f32.mrb[2].mxu0 }
 0x425   : > { %v983_v51 = vpop.f32.mrb[3].mxu0  ;;  %v1055_v52 = vadd.f32 %v1054_v48, %v981_v50 }
 0x428   : > { %v1137_v53 = vpop.f32.mrb[4].mxu0 }
 0x429   : > { %v1141_v55 = vadd.f32 %v1137_v53, %v1055_v52  ;;  %v1139_v56 = vpop.f32.mrb[5].mxu0 }
 0x42b   : > { %v1148_v57 = vadd.f32 %v1146_v54, %v1141_v55 }
 0x42d   : > { %v1149_v58 = vmax.f32 %v1148_v57, 0.0 }
 0x42f   : > { %1150 = vst [vmem:[%s244_s21] sm:$0xf] %v1149_v58 }
 0x430   : > { %1389 = shalt.err (!%p1386_p3)
}
 0x431   : > { %s1390_s15 = scalar_lea.hbm %s1648_s10, 64  ;;  %s1394_s18 = scalar_lea.hbm %s1706_s7, 128 }
 0x432   : > { %p1391_p5 = scmp.ne.s32.totalorder %s1648_s10, %s1390_s15  ;;  %p1395_p9 = scmp.lt.u32.totalorder %s1648_s10, %s1706_s7 }
 0x433   : > { %p1396_p10 = scmp.lt.u32.totalorder %s1394_s18, %s1390_s15  ;;  %p1398_p12 = scmp.lt.u32.totalorder %s1390_s15, %s1648_s10 }
 0x434   : > { %p1392_p6 = pnand %p1391_p5, %p1545_p4 }
 0x435   : > { %p1397_p11 = por %p1396_p10, %p1395_p9 }
 0x436   : > { %p1393_p7 = pneg %p1392_p6 }
 0x437   : > { %p1399_p13 = por %p1398_p12, %p1397_p11 }
 0x439   : > { %p1400_p0 = pnand %p1399_p13, %p1393_p7 }
 0x43b   : > { %1403 = shalt.err (!%p1400_p0)
}
 0x43c   : > { %1313 = dma.vmem_to_hbm [thread:$0]  (%p1545_p4), %s1650_s20, 64, %s1648_s10, %s1152_s12  }
 0x43d PF: > { %p1319_p1 = scmp.ge.s32.totalorder %s1456_s29, 2  ;;  %s1178_s8 = sand.u32 1, %s1436_s24  }
 0x43e   : > { %s1179_s23 = scalar_lea.sflag [#allocation5], %s1178_s8 }
 0x43f   : > { %p1316_p2 = pnand %p1319_p1, %p1552_p8 }
 0x441   : > { %1431 = dma.done.wait (!%p1316_p2), %s1179_s23, 64  }
 0x442   : > { %1433 = vsyncadd (!%p1316_p2), %s1179_s23, 4294967232  ;;  %s20_s29 = sadd.s32 1, %s1456_s29   ;;  %s1709_s24 = smov %s1440_s25 }
 0x443   : > { %p17_p3 = scmp.ge.s32.totalorder %s20_s29, 4   ;;  %s1710_s25 = smov %s1444_s26 }
 0x444   : > { %s1711_s26 = smov %s1558_s14  ;;  %s1712_s27 = smov %s1452_s28 }
 0x445   : > { %s1713_s28 = smov %s1715_s9  ;;  %19 = sbr.rel (!%p17_p3) target bundleno = 4 (0x4), region = 181 }
 0x44c   :  { %1184 = vsyncpa [#allocation5], 1 }
 0x44d   :  { %1186 = vsyncpa [#allocation5 + $0x1], 1 }
 0x44e   :  { %1187 = vsyncmov [#allocation3] }
 0x451   :  { %s1188_s11 = vpop.sfrf %1187 }
 0x452   :  { %p1300_p4 = scmp.ne.s32.totalorder %s1188_s11, 0 }
 0x454   :  { %1192 = shalt.err (%p1300_p4)  }
 0x455   :  { %1194 = vsyncmov [#allocation3 + $0x1] }
 0x458   :  { %s1195_s13 = vpop.sfrf %1194 }
 0x459   :  { %p1301_p8 = scmp.ne.s32.totalorder %s1195_s13, 0 }
 0x45b   :  { %1199 = shalt.err (%p1301_p8)  }

</bundles_post_ra>
